<compile_context>
chip_gen: v5e
topology: v5e:2x2
jax: 0.10.0
libtpu: 0.0.40
codegen_flags: <defaults>
</compile_context>

<pallas_src>
import jax
import jax.numpy as jnp
from jax import lax
from jax.experimental import pallas as pl
from jax.experimental.pallas import tpu as pltpu


def _mlp_proj_kernel(x_ref, w_ref, b_ref, o_ref):
    # x_ref: (C, tq)   -- native NCHW slab, C on sublanes, spatial on lanes
    # w_ref: (C, E)    -- transposed nn.Linear weight
    # b_ref: (1, E)
    # o_ref: (tq, E)
    acc = lax.dot_general(
        x_ref[...],
        w_ref[...],
        dimension_numbers=(((0,), (0,)), ((), ())),  # trans-A: contract C with C
        preferred_element_type=jnp.float32,
    )                                                # (tq, E), f32 accumulation
    o_ref[...] = (acc + b_ref[...].astype(jnp.float32)).astype(o_ref.dtype)


def _choose_tq(hw, c, e, itemsize, max_tq, vmem_budget_bytes):
    """Pick the spatial tile size (lane dim of the x tile)."""

    def est(t):
        # double-buffered x tile + out tile, plus resident weight + bias
        return (2 * t * (c + e) + c * e + e) * itemsize

    if hw <= max_tq and est(hw) <= vmem_budget_bytes:
        return hw  # full spatial extent: always layout-legal, single tile per image
    t = min(max_tq, hw)
    t = max(128, (t // 128) * 128)  # lane dim must be a multiple of 128
    while t > 128 and est(t) > vmem_budget_bytes:
        t -= 128
    return t


def mlp_forward(x_nchw, weight, bias, *, max_tq=2048,
                vmem_budget_bytes=24 * 1024 * 1024):
    """SegFormer MLP forward.

    Args:
      x_nchw: (B, C, H, W) input, NCHW (PyTorch convention).
      weight: (embed_dim, input_dim) — same layout as nn.Linear.weight.
      bias:   (embed_dim,)           — same layout as nn.Linear.bias.
    Returns:
      (B, H*W, embed_dim)
    """
    B, C, H, W = x_nchw.shape
    E, C_in = weight.shape
    assert C_in == C, "input_dim mismatch"
    HW = H * W

    # Free, contiguous reshape — NO transpose pass in HBM.
    x3 = x_nchw.reshape(B, C, HW)
    w_t = jnp.asarray(weight).T          # (C, E); tiny, one-time
    b2d = jnp.asarray(bias).reshape(1, E)

    itemsize = jnp.dtype(x_nchw.dtype).itemsize
    tq = _choose_tq(HW, C, E, itemsize, max_tq, vmem_budget_bytes)
    n_tiles = pl.cdiv(HW, tq)

    out = pl.pallas_call(
        _mlp_proj_kernel,
        out_shape=jax.ShapeDtypeStruct((B, HW, E), x_nchw.dtype),
        grid_spec=pltpu.PrefetchScalarGridSpec(
            num_scalar_prefetch=0,
            grid=(B, n_tiles),
            in_specs=[
                # x: (B, C, HW), kernel sees the squeezed (C, tq) slab.
                pl.BlockSpec((None, C, tq), lambda b, i: (b, 0, i)),
                # weight (C, E): resident across the whole grid.
                pl.BlockSpec((C, E), lambda b, i: (0, 0)),
                # bias (1, E): resident.
                pl.BlockSpec((1, E), lambda b, i: (0, 0)),
            ],
            # out: (B, HW, E), kernel sees the squeezed (tq, E) tile.
            out_specs=pl.BlockSpec((None, tq, E), lambda b, i: (b, i, 0)),
        ),
        compiler_params=pltpu.CompilerParams(
            dimension_semantics=("parallel", "parallel"),
            vmem_limit_bytes=40 * 1024 * 1024,
        ),
    )(x3, w_t, b2d)

    return out  # (B, H*W, E)


if __name__ == "__main__":
    # Small shapes consistent with the module: input_dim = C = 32,
    # embed_dim = E = 128 (lane-dense output, like the real 256/768 heads).
    B, C, H, W = 2, 32, 16, 16
    E = 128

    key = jax.random.PRNGKey(0)
    kx, kw, kb = jax.random.split(key, 3)

    x = jax.random.normal(kx, (B, C, H, W), dtype=jnp.float32)

    # Deterministic param init mimicking nn.Linear default: U(-1/sqrt(C), 1/sqrt(C)).
    bound = 1.0 / (C ** 0.5)
    weight = jax.random.uniform(kw, (E, C), dtype=jnp.float32,
                                minval=-bound, maxval=bound)
    bias = jax.random.uniform(kb, (E,), dtype=jnp.float32,
                              minval=-bound, maxval=bound)

    out = jax.block_until_ready(mlp_forward(x, weight, bias))

    # Reference in plain JAX (same semantics as the PyTorch forward).
    tokens_ref = jnp.transpose(x.reshape(B, C, H * W), (0, 2, 1))  # (B, HW, C)
    ref = jnp.einsum("bnc,ec->bne", tokens_ref, weight) + bias

    assert out.shape == (B, H * W, E)
    assert jnp.allclose(out, ref, atol=1e-5, rtol=1e-5), "mismatch vs reference"

    print("KERNEL_OK")
</pallas_src>

<mosaic_0001>
module attributes {stable_mosaic.version = 11 : i64} {
  func.func @_mlp_proj_kernel(%arg0: i32, %arg1: i32, %arg2: memref<1x32x256xf32, #tpu.memory_space<vmem>>, %arg3: memref<32x128xf32, #tpu.memory_space<vmem>>, %arg4: memref<1x128xf32, #tpu.memory_space<vmem>>, %arg5: memref<1x256x128xf32, #tpu.memory_space<vmem>>) attributes {dimension_semantics = [#tpu.dimension_semantics<parallel>, #tpu.dimension_semantics<parallel>], iteration_bounds = array<i64: 2, 1>, scalar_prefetch = 0 : i64, scratch_operands = 0 : i64, tpu.core_type = #tpu.core_type<tc>, window_params = [{transform_indices = @transform_0, window_bounds = array<i64: 1, 32, 256>}, {pipeline_mode = #tpu.pipeline_mode<synchronous>, transform_indices = @transform_1, window_bounds = array<i64: 32, 128>}, {pipeline_mode = #tpu.pipeline_mode<synchronous>, transform_indices = @transform_2, window_bounds = array<i64: 1, 128>}, {transform_indices = @transform_3, window_bounds = array<i64: 1, 256, 128>}]} {
    %c0 = arith.constant 0 : index
    %c0_0 = arith.constant 0 : index
    %c0_1 = arith.constant 0 : index
    %0 = vector.load %arg2[%c0, %c0_0, %c0_1] : memref<1x32x256xf32, #tpu.memory_space<vmem>>, vector<1x32x256xf32>
    %1 = vector.shape_cast %0 : vector<1x32x256xf32> to vector<32x256xf32>
    %c0_2 = arith.constant 0 : index
    %c0_3 = arith.constant 0 : index
    %2 = vector.load %arg3[%c0_2, %c0_3] : memref<32x128xf32, #tpu.memory_space<vmem>>, vector<32x128xf32>
    %cst = arith.constant dense<0.000000e+00> : vector<256x128xf32>
    %3 = tpu.matmul %1, %2, %cst {dimension_numbers = #tpu.dot_dimension_numbers<[0], [0], [1], [1], [0, 1, 1, 1], [], []>} : vector<32x256xf32>, vector<32x128xf32>, vector<256x128xf32> -> vector<256x128xf32>
    %c0_4 = arith.constant 0 : index
    %c0_5 = arith.constant 0 : index
    %4 = vector.load %arg4[%c0_4, %c0_5] : memref<1x128xf32, #tpu.memory_space<vmem>>, vector<1x128xf32>
    %5 = vector.broadcast %4 : vector<1x128xf32> to vector<256x128xf32>
    %6 = arith.addf %3, %5 : vector<256x128xf32>
    %c0_6 = arith.constant 0 : index
    %c0_7 = arith.constant 0 : index
    %c0_8 = arith.constant 0 : index
    %7 = vector.load %arg5[%c0_6, %c0_7, %c0_8] : memref<1x256x128xf32, #tpu.memory_space<vmem>>, vector<1x256x128xf32>
    %8 = vector.shape_cast %7 : vector<1x256x128xf32> to vector<256x128xf32>
    %9 = vector.shape_cast %6 : vector<256x128xf32> to vector<1x256x128xf32>
    tpu.vector_store %arg5[%c0_6, %c0_7, %c0_8], %9 {strides = array<i32>} : memref<1x256x128xf32, #tpu.memory_space<vmem>>, vector<1x256x128xf32>,
    return
  }
  func.func @transform_0(%arg0: i32, %arg1: i32) -> (i32, i32, i32) {
    %c0_i32 = arith.constant 0 : i32
    %c0_i32_0 = arith.constant 0 : i32
    return %arg0, %c0_i32, %arg1 : i32, i32, i32
  }
  func.func @transform_1(%arg0: i32, %arg1: i32) -> (i32, i32) {
    %c0_i32 = arith.constant 0 : i32
    %c0_i32_0 = arith.constant 0 : i32
    %c0_i32_1 = arith.constant 0 : i32
    return %c0_i32, %c0_i32_0 : i32, i32
  }
  func.func @transform_2(%arg0: i32, %arg1: i32) -> (i32, i32) {
    %c0_i32 = arith.constant 0 : i32
    %c0_i32_0 = arith.constant 0 : i32
    %c0_i32_1 = arith.constant 0 : i32
    return %c0_i32, %c0_i32_0 : i32, i32
  }
  func.func @transform_3(%arg0: i32, %arg1: i32) -> (i32, i32, i32) {
    %c0_i32 = arith.constant 0 : i32
    %c0_i32_0 = arith.constant 0 : i32
    return %arg0, %arg1, %c0_i32 : i32, i32, i32
  }
}

</mosaic_0001>

<bundles_post_ra>
// kernel: tpu_custom_call.1
= control target key start
LH: loop header
LB: loop body
LE: loop exit
PB: predicated region body
PF: predicated region fallthrough
CT: control target
= control target key end

     0   :  { %s1248_s0 = inlined_call_operand.hbm [shape: f32[2,32,256], index: 0, kind: input, shape index: {}]   ;;  %s1249_s1 = inlined_call_operand.hbm [shape: f32[32,128], index: 1, kind: input, shape index: {}]   ;;  %s1250_s2 = inlined_call_operand.vmem [shape: f32[1,128], index: 2, kind: input, shape index: {}]   ;;  %s1251_s3 = inlined_call_operand.hbm [shape: f32[2,256,128], index: 3, kind: output, shape index: {}]  }
   0x1   :  { %1252 = sst [smem:[#allocation11_spill]] %s1249_s1 }
   0x2   :  { %8 = vsyncpa [#allocation3], 0 }
   0x3   :  { %10 = vsyncpa [#allocation3 + $0x1], 0 }
   0x4   :  { %11 = vsyncpa [#allocation6], 0 }
   0x5   :  { %12 = vsyncpa [#allocation4], 0 }
   0x6   :  { %14 = vsyncpa [#allocation4 + $0x1], 0  ;;  %s984_s12 = smov 0   ;;  %s986_s13 = smov 0  }
   0x7   :  { %s988_s14 = smov 0   ;;  %s990_s15 = smov 0  }
   0x8   :  { %s992_s16 = smov 0   ;;  %s994_s17 = smov 0  }
   0x9 LB: > { %s665_s18 = sadd.s32 4294967295, %s955_s17   ;;  %s666_s19 = sadd.s32 4294967294, %s955_s17   ;;  %s955_s17 = sphi %s994_s17, %s20_s17   ;;  %s951_s16 = sphi %s992_s16, %s1265_s16   ;;  %s947_s15 = sphi %s990_s15, %s1264_s15   ;;  %s943_s14 = sphi %s988_s14, %s1263_s14   ;;  %s939_s13 = sphi %s986_s13, %s1262_s13   ;;  %s935_s12 = sphi %s984_s12, %s1261_s12  }
   0xa   : > { %p54_p0 = scmp.ne.s32.totalorder %s939_s13, %s935_s12  ;;  %p1018_p1 = scmp.eq.s32.totalorder %s665_s18, 0 }
   0xb   : > { %p1022_p2 = scmp.eq.s32.totalorder %s665_s18, 1  ;;  %p128_p3 = scmp.eq.s32.totalorder %s666_s19, 1 }
   0xc   : > { %p1028_p4 = por %p1018_p1, %p54_p0  ;;  %p667_p5 = scmp.ge.s32.totalorder %s955_s17, 1 }
   0xd   : > { %p1033_p6 = por %p128_p3, %p54_p0  ;;  %p135_p7 = scmp.lt.s32.totalorder %s955_s17, 3 }
   0xe   : > { %s1257_s1 = sld [smem:[#allocation11_spill]]  ;;  %s957_s28 = smov [#allocation5]  }
   0xf   : > { %p1041_p8 = pnand %p667_p5, %p135_p7  ;;  %s148_s29 = sshll.u32 %s957_s28, 4  ;;  %s149_s29 = int_to_ptr.vmem [resolvable:$true] %s148_s29 }
  0x10   : > { %p669_p11 = scmp.ge.s32.totalorder %s955_s17, 2  ;;  %s958_s30 = smov 128  }
  0x11   : > { %p736_p9 = pneg %p1041_p8  ;;  %s959_s4 = smov 8  }
  0x12   : > { %s32_s5 = sadd.s32 1, %s951_s16  ;;  %s41_s6 = sadd.s32 1, %s943_s14 }
  0x13   : > { %p737_p10 = pnand %p736_p9, %p1018_p1  ;;  %p34_p12 = scmp.ge.s32.totalorder %s32_s5, 2 }
  0x14   : > { %s146_s26 = sshll.u32 %s1257_s1, 4  ;;  %p48_p13 = scmp.ne.s32.totalorder %s943_s14, %s939_s13  ;;  %s147_s26 = int_to_ptr.hbm [resolvable:$true] %s146_s26 }
  0x15   : > { %739 = dma.hbm_to_vmem [thread:$0]  (!%p737_p10), %s147_s26, 512, %s149_s29, [#allocation6], %s958_s30, %s958_s30, %s959_s4  }
  0x16   : > { %p49_p0 = scmp.eq.s32.totalorder %s955_s17, 0  ;;  %s1267_s5 = smov (%p34_p12, %s32_s5), 0 }
  0x17   : > { %p1063_p5 = por %p1022_p2, %p48_p13  ;;  %s36_s9 = ssub.s32 %s951_s16, %s1267_s5 }
  0x18   : > { %p1057_p3 = por %p49_p0, %p48_p13  ;;  %p749_p7 = scmp.lt.s32.totalorder %s955_s17, 2 }
  0x19   : > { %p39_p9 = scmp.eq.s32.totalorder %s36_s9, 0  ;;  %s165_s10 = sand.u32 1, %s943_s14  }
  0x1a   : > { %s670_s11 = sshll.u32 %s165_s10, 6  ;;  %s714_s19 = sshll.u32 %s951_s16, 6 }
  0x1b   : > { %s1072_s18 = scalar_select %p39_p9, %s943_s14, %s41_s6  }
  0x1c   : > { %s176_s26 = scalar_lea.hbm %s1248_s0, %s714_s19  ;;  %s169_s28 = scalar_lea.vmem [#allocation2], %s670_s11 }
  0x1d   : > { %s179_s29 = sshll.u32 %s169_s28, 4  ;;  %s177_s21 = sshll.u32 %s176_s26, 4  ;;  %s180_s29 = int_to_ptr.vmem [resolvable:$true] %s179_s29  ;;  %s178_s21 = int_to_ptr.hbm [resolvable:$true] %s177_s21 }
  0x1e   : > { %p741_p2 = pnand %p749_p7, %p1057_p3  ;;  %s166_s30 = scalar_lea.sflag [#allocation3], %s165_s10 }
  0x1f   : > { %s960_s4 = smov 256   ;;  %s961_s1 = smov 16  }
  0x20   : > { %743 = dma.hbm_to_vmem [thread:$0]  (!%p741_p2), %s178_s21, 1024, %s180_s29, %s166_s30, %s960_s4, %s960_s4, %s961_s1  }
  0x21   : > { %191 = sbr.rel (%p1041_p8) target bundleno = 465 (0x1d1), region = 32  ;;  %s1083_s6 = sand.u32 (!%p1041_p8), 1, %s939_s13  }
  0x22   : > { %s674_s9 = sshll.u32 (!%p1041_p8), %s1083_s6, 6  ;;  %s194_s11 = scalar_lea.sflag (!%p1041_p8), [#allocation3], %s1083_s6 }
  0x23   : > { %s1087_s19 = scalar_lea.vmem (!%p1041_p8), [#allocation2], %s674_s9 }
  0x26   : > { %922 = dma.done.wait (%p1028_p4), %s194_s11, 1024  }
  0x27   : > { %924 = vsyncadd (%p1028_p4), %s194_s11, 4294966272 }
  0x28   : > { %926 = dma.done.wait (%p1018_p1), [#allocation6], 512  }
  0x29   : > { %928 = vsyncadd (%p1018_p1), [#allocation6], 4294966784  ;;  %v229_v0 = vld [vmem:[%s1087_s19 + $0x8] sm:$0xff]  ;;  %v228_v1 = vld [vmem:[%s1087_s19] sm:$0xff]  ;;  %vm308_vm0 = vcmask 261120   ;;  %s676_s1 = sshll.u32 %s1083_s6, 8 }
  0x2a   : > { %276 = vxpose.xlu0.b32.start [1/4] (short) %v229_v0, 128  ;;  %244 = vxpose.xlu1.b32.start [1/4] (short) %v228_v1, 128  ;;  %v239_v2 = vld [vmem:[#allocation5 + $0x18] sm:$0xff]  ;;  %v238_v3 = vld [vmem:[#allocation5 + $0x10] sm:$0xff]  ;;  %v237_v4 = vld [vmem:[#allocation5 + $0x8] sm:$0xff]  ;;  %s1144_s27 = scalar_lea.vmem [#allocation7], %s676_s1  ;;  %s715_s7 = sshll.u32 %s947_s15, 8 }
  0x2b   : > { %717 = vmatpush.msra.mxu2 %v239_v2  ;;  %417 = vmatpush.msra.mxu0 %v239_v2  ;;  %v231_v5 = vld [vmem:[%s1087_s19 + $0x18] sm:$0xff]  ;;  %v230_v6 = vld [vmem:[%s1087_s19 + $0x10] sm:$0xff]  ;;  %v236_v7 = vld [vmem:[#allocation5] sm:$0xff]  ;;  %s564_s25 = scalar_lea.hbm %s1251_s3, %s715_s7  ;;  %s565_s26 = sshll.u32 %s1144_s27, 4  ;;  %s566_s26 = int_to_ptr.vmem [resolvable:$true] %s565_s26 }
  0x2c   : > { %718 = vmatpush.msra.mxu3 %v239_v2  ;;  %716 = vmatpush.msra.mxu1 %v239_v2  ;;  %v233_v8 = vld [vmem:[%s1087_s19 + $0x28] sm:$0xff]  ;;  %v232_v9 = vld [vmem:[%s1087_s19 + $0x20] sm:$0xff]  ;;  %v235_v10 = vld [vmem:[%s1087_s19 + $0x38] sm:$0xff]  ;;  %s567_s28 = sshll.u32 %s564_s25, 4  ;;  %s551_s15 = scalar_lea.sflag [#allocation4], %s1083_s6  ;;  %s568_s28 = int_to_ptr.hbm [resolvable:$true] %s567_s28 }
  0x2d   : > { %720 = vmatpush.msra.mxu2 %v238_v3  ;;  %418 = vmatpush.msra.mxu0 %v238_v3  ;;  %v234_v11 = vld [vmem:[%s1087_s19 + $0x30] sm:$0xff]  ;;  %v1141_v44 = vld [vmem:[%s1250_s2] ss:$0 sm:$0xff]  ;;  %s883_s29 = sshra.s32 %s568_s28, 4  ;;  %s889_s9 = scalar_lea.hbm %s1251_s3, 512  ;;  %s884_s29 = int_to_ptr.hbm [resolvable:$true] %s883_s29 }
  0x2e   : > { %721 = vmatpush.msra.mxu3 %v238_v3  ;;  %719 = vmatpush.msra.mxu1 %v238_v3  ;;  %s885_s21 = scalar_lea.hbm %s884_s29, 256  ;;  %p890_p10 = scmp.lt.s32.totalorder %s884_s29, %s1251_s3 }
  0x2f   : > { %723 = vmatpush.msra.mxu2 %v237_v4  ;;  %419 = vmatpush.msra.mxu0 %v237_v4  ;;  %p886_p1 = scmp.ne.s32.totalorder %s884_s29, %s885_s21  ;;  %p891_p12 = scmp.lt.s32.totalorder %s889_s9, %s885_s21 }
  0x30   : > { %724 = vmatpush.msra.mxu3 %v237_v4  ;;  %722 = vmatpush.msra.mxu1 %v237_v4 }
  0x31   : > { %726 = vmatpush.msra.mxu2 %v236_v7  ;;  %420 = vmatpush.msra.mxu0 %v236_v7  ;;  %p887_p4 = pnand %p886_p1, %p1063_p5  ;;  %p892_p13 = por %p891_p12, %p890_p10 }
  0x32   : > { %277 = vxpose.xlu0.b32.cont [2/4] (short) %v231_v5, 128  ;;  %245 = vxpose.xlu1.b32.cont [2/4] (short) %v230_v6, 128 }
  0x33   : > { %727 = vmatpush.msra.mxu3 %v236_v7  ;;  %725 = vmatpush.msra.mxu1 %v236_v7  ;;  %p888_p8 = pneg %p887_p4 }
  0x35   : > { %p893_p0 = pnand %p892_p13, %p888_p8 }
  0x3a   : > { %278 = vxpose.xlu0.b32.cont [3/4] (short) %v233_v8, 128  ;;  %246 = vxpose.xlu1.b32.cont [3/4] (short) %v232_v9, 128 }
  0x42   : > { %279 = vxpose.xlu0.b32.end [4/4] (short) %v235_v10, 128  ;;  %247 = vxpose.xlu1.b32.end [4/4] (short) %v234_v11, 128 }
  0xce   : > { %v292_v12 = vpop.trf.xlu0  ;;  %v260_v13 = vpop.trf.xlu1 }
  0xcf   : > { %693 = vmatmul.msk.f32.vlgmr.msra.gmra.mxu2 %vm308_vm0, %v292_v12  ;;  %677 = vmatmul.msk.f32.vlgmr.msra.gmra.mxu0 %vm308_vm0, %v260_v13 }
  0xd6   : > { %v293_v14 = vpop.trf.xlu0  ;;  %v261_v15 = vpop.trf.xlu1 }
  0xd7   : > { %694 = vmatmul.msk.f32.gmra.mxu2 %vm308_vm0, %v293_v14  ;;  %678 = vmatmul.msk.f32.gmra.mxu0 %vm308_vm0, %v261_v15 }
  0xde   : > { %v294_v16 = vpop.trf.xlu0  ;;  %v262_v17 = vpop.trf.xlu1 }
  0xdf   : > { %695 = vmatmul.msk.f32.gmra.mxu2 %vm308_vm0, %v294_v16  ;;  %679 = vmatmul.msk.f32.gmra.mxu0 %vm308_vm0, %v262_v17 }
  0xe6   : > { %v295_v18 = vpop.trf.xlu0  ;;  %v263_v19 = vpop.trf.xlu1 }
  0xe7   : > { %696 = vmatmul.msk.f32.gmra.mxu2 %vm308_vm0, %v295_v18  ;;  %680 = vmatmul.msk.f32.gmra.mxu0 %vm308_vm0, %v263_v19 }
  0xee   : > { %v296_v20 = vpop.trf.xlu0  ;;  %v264_v21 = vpop.trf.xlu1 }
  0xef   : > { %697 = vmatmul.msk.f32.gmra.mxu2 %vm308_vm0, %v296_v20  ;;  %681 = vmatmul.msk.f32.gmra.mxu0 %vm308_vm0, %v264_v21 }
  0xf6   : > { %v297_v22 = vpop.trf.xlu0  ;;  %v265_v23 = vpop.trf.xlu1 }
  0xf7   : > { %698 = vmatmul.msk.f32.gmra.mxu2 %vm308_vm0, %v297_v22  ;;  %682 = vmatmul.msk.f32.gmra.mxu0 %vm308_vm0, %v265_v23 }
  0xfe   : > { %v298_v24 = vpop.trf.xlu0  ;;  %v266_v25 = vpop.trf.xlu1 }
  0xff   : > { %699 = vmatmul.msk.f32.gmra.mxu2 %vm308_vm0, %v298_v24  ;;  %683 = vmatmul.msk.f32.gmra.mxu0 %vm308_vm0, %v266_v25 }
 0x106   : > { %v299_v26 = vpop.trf.xlu0  ;;  %v267_v27 = vpop.trf.xlu1 }
 0x107   : > { %700 = vmatmul.msk.f32.gmra.mxu2 %vm308_vm0, %v299_v26  ;;  %684 = vmatmul.msk.f32.gmra.mxu0 %vm308_vm0, %v267_v27 }
 0x10e   : > { %v300_v28 = vpop.trf.xlu0  ;;  %v268_v29 = vpop.trf.xlu1 }
 0x10f   : > { %701 = vmatmul.msk.f32.vlgmr.msra.gmra.mxu3 %vm308_vm0, %v300_v28  ;;  %685 = vmatmul.msk.f32.vlgmr.msra.gmra.mxu1 %vm308_vm0, %v268_v29 }
 0x116   : > { %v301_v30 = vpop.trf.xlu0  ;;  %v269_v31 = vpop.trf.xlu1 }
 0x117   : > { %702 = vmatmul.msk.f32.gmra.mxu3 %vm308_vm0, %v301_v30  ;;  %686 = vmatmul.msk.f32.gmra.mxu1 %vm308_vm0, %v269_v31 }
 0x11e   : > { %v302_v32 = vpop.trf.xlu0  ;;  %v270_v33 = vpop.trf.xlu1 }
 0x11f   : > { %703 = vmatmul.msk.f32.gmra.mxu3 %vm308_vm0, %v302_v32  ;;  %687 = vmatmul.msk.f32.gmra.mxu1 %vm308_vm0, %v270_v33 }
 0x126   : > { %v303_v34 = vpop.trf.xlu0  ;;  %v271_v35 = vpop.trf.xlu1 }
 0x127   : > { %704 = vmatmul.msk.f32.gmra.mxu3 %vm308_vm0, %v303_v34  ;;  %688 = vmatmul.msk.f32.gmra.mxu1 %vm308_vm0, %v271_v35 }
 0x12e   : > { %v304_v36 = vpop.trf.xlu0  ;;  %v272_v37 = vpop.trf.xlu1 }
 0x12f   : > { %705 = vmatmul.msk.f32.gmra.mxu3 %vm308_vm0, %v304_v36  ;;  %689 = vmatmul.msk.f32.gmra.mxu1 %vm308_vm0, %v272_v37 }
 0x136   : > { %v305_v38 = vpop.trf.xlu0  ;;  %v273_v39 = vpop.trf.xlu1 }
 0x137   : > { %706 = vmatmul.msk.f32.gmra.mxu3 %vm308_vm0, %v305_v38  ;;  %690 = vmatmul.msk.f32.gmra.mxu1 %vm308_vm0, %v273_v39 }
 0x13e   : > { %v306_v40 = vpop.trf.xlu0  ;;  %v274_v41 = vpop.trf.xlu1 }
 0x13f   : > { %707 = vmatmul.msk.f32.gmra.mxu3 %vm308_vm0, %v306_v40  ;;  %691 = vmatmul.msk.f32.gmra.mxu1 %vm308_vm0, %v274_v41 }
 0x146   : > { %v307_v42 = vpop.trf.xlu0  ;;  %v275_v43 = vpop.trf.xlu1 }
 0x147   : > { %708 = vmatmul.msk.f32.gmra.mxu3 %vm308_vm0, %v307_v42  ;;  %692 = vmatmul.msk.f32.gmra.mxu1 %vm308_vm0, %v275_v43 }
 0x14c   : > { %v422_v45 = vpop.f32.mrf.mxu0 }
 0x14d   : > { %v423_v46 = vadd.f32 %v1141_v44, %v422_v45 }
 0x14f   : > { %518 = vst [vmem:[%s1144_s27] sm:$0xff] %v423_v46 }
 0x152   : > { %v470_v47 = vpop.f32.mrf.mxu2 }
 0x153   : > { %v471_v48 = vadd.f32 %v1141_v44, %v470_v47 }
 0x154   : > { %v425_v49 = vpop.f32.mrf.mxu0 }
 0x155   : > { %534 = vst [vmem:[%s1144_s27 + $0x80] sm:$0xff] %v471_v48  ;;  %v426_v50 = vadd.f32 %v1141_v44, %v425_v49 }
 0x157   : > { %519 = vst [vmem:[%s1144_s27 + $0x8] sm:$0xff] %v426_v50 }
 0x15a   : > { %v473_v51 = vpop.f32.mrf.mxu2 }
 0x15b   : > { %v474_v52 = vadd.f32 %v1141_v44, %v473_v51 }
 0x15c   : > { %v428_v53 = vpop.f32.mrf.mxu0 }
 0x15d   : > { %535 = vst [vmem:[%s1144_s27 + $0x88] sm:$0xff] %v474_v52  ;;  %v429_v54 = vadd.f32 %v1141_v44, %v428_v53 }
 0x15f   : > { %520 = vst [vmem:[%s1144_s27 + $0x10] sm:$0xff] %v429_v54 }
 0x162   : > { %v476_v55 = vpop.f32.mrf.mxu2 }
 0x163   : > { %v477_v56 = vadd.f32 %v1141_v44, %v476_v55 }
 0x164   : > { %v431_v57 = vpop.f32.mrf.mxu0 }
 0x165   : > { %536 = vst [vmem:[%s1144_s27 + $0x90] sm:$0xff] %v477_v56  ;;  %v432_v58 = vadd.f32 %v1141_v44, %v431_v57 }
 0x167   : > { %521 = vst [vmem:[%s1144_s27 + $0x18] sm:$0xff] %v432_v58 }
 0x16a   : > { %v479_v59 = vpop.f32.mrf.mxu2 }
 0x16b   : > { %v480_v60 = vadd.f32 %v1141_v44, %v479_v59 }
 0x16c   : > { %v434_v61 = vpop.f32.mrf.mxu0 }
 0x16d   : > { %537 = vst [vmem:[%s1144_s27 + $0x98] sm:$0xff] %v480_v60  ;;  %v435_v62 = vadd.f32 %v1141_v44, %v434_v61 }
 0x16f   : > { %522 = vst [vmem:[%s1144_s27 + $0x20] sm:$0xff] %v435_v62 }
 0x172   : > { %v482_v63 = vpop.f32.mrf.mxu2 }
 0x173   : > { %v483_v0 = vadd.f32 %v1141_v44, %v482_v63 }
 0x174   : > { %v437_v1 = vpop.f32.mrf.mxu0 }
 0x175   : > { %538 = vst [vmem:[%s1144_s27 + $0xa0] sm:$0xff] %v483_v0  ;;  %v438_v2 = vadd.f32 %v1141_v44, %v437_v1 }
 0x177   : > { %523 = vst [vmem:[%s1144_s27 + $0x28] sm:$0xff] %v438_v2 }
 0x17a   : > { %v485_v3 = vpop.f32.mrf.mxu2 }
 0x17b   : > { %v486_v4 = vadd.f32 %v1141_v44, %v485_v3 }
 0x17c   : > { %v440_v5 = vpop.f32.mrf.mxu0 }
 0x17d   : > { %539 = vst [vmem:[%s1144_s27 + $0xa8] sm:$0xff] %v486_v4  ;;  %v441_v6 = vadd.f32 %v1141_v44, %v440_v5 }
 0x17f   : > { %524 = vst [vmem:[%s1144_s27 + $0x30] sm:$0xff] %v441_v6 }
 0x182   : > { %v488_v7 = vpop.f32.mrf.mxu2 }
 0x183   : > { %v489_v8 = vadd.f32 %v1141_v44, %v488_v7 }
 0x184   : > { %v443_v9 = vpop.f32.mrf.mxu0 }
 0x185   : > { %540 = vst [vmem:[%s1144_s27 + $0xb0] sm:$0xff] %v489_v8  ;;  %v444_v10 = vadd.f32 %v1141_v44, %v443_v9 }
 0x187   : > { %525 = vst [vmem:[%s1144_s27 + $0x38] sm:$0xff] %v444_v10 }
 0x18a   : > { %v491_v11 = vpop.f32.mrf.mxu2 }
 0x18b   : > { %v492_v12 = vadd.f32 %v1141_v44, %v491_v11 }
 0x18c   : > { %v446_v13 = vpop.f32.mrf.mxu1 }
 0x18d   : > { %541 = vst [vmem:[%s1144_s27 + $0xb8] sm:$0xff] %v492_v12  ;;  %v447_v14 = vadd.f32 %v1141_v44, %v446_v13 }
 0x18f   : > { %526 = vst [vmem:[%s1144_s27 + $0x40] sm:$0xff] %v447_v14 }
 0x192   : > { %v494_v15 = vpop.f32.mrf.mxu3 }
 0x193   : > { %v495_v16 = vadd.f32 %v1141_v44, %v494_v15 }
 0x194   : > { %v449_v17 = vpop.f32.mrf.mxu1 }
 0x195   : > { %542 = vst [vmem:[%s1144_s27 + $0xc0] sm:$0xff] %v495_v16  ;;  %v450_v18 = vadd.f32 %v1141_v44, %v449_v17 }
 0x197   : > { %527 = vst [vmem:[%s1144_s27 + $0x48] sm:$0xff] %v450_v18 }
 0x19a   : > { %v497_v19 = vpop.f32.mrf.mxu3 }
 0x19b   : > { %v498_v20 = vadd.f32 %v1141_v44, %v497_v19 }
 0x19c   : > { %v452_v21 = vpop.f32.mrf.mxu1 }
 0x19d   : > { %543 = vst [vmem:[%s1144_s27 + $0xc8] sm:$0xff] %v498_v20  ;;  %v453_v22 = vadd.f32 %v1141_v44, %v452_v21 }
 0x19f   : > { %528 = vst [vmem:[%s1144_s27 + $0x50] sm:$0xff] %v453_v22 }
 0x1a2   : > { %v500_v23 = vpop.f32.mrf.mxu3 }
 0x1a3   : > { %v501_v24 = vadd.f32 %v1141_v44, %v500_v23 }
 0x1a4   : > { %v455_v25 = vpop.f32.mrf.mxu1 }
 0x1a5   : > { %544 = vst [vmem:[%s1144_s27 + $0xd0] sm:$0xff] %v501_v24  ;;  %v456_v26 = vadd.f32 %v1141_v44, %v455_v25 }
 0x1a7   : > { %529 = vst [vmem:[%s1144_s27 + $0x58] sm:$0xff] %v456_v26 }
 0x1aa   : > { %v503_v27 = vpop.f32.mrf.mxu3 }
 0x1ab   : > { %v504_v28 = vadd.f32 %v1141_v44, %v503_v27 }
 0x1ac   : > { %v458_v29 = vpop.f32.mrf.mxu1 }
 0x1ad   : > { %545 = vst [vmem:[%s1144_s27 + $0xd8] sm:$0xff] %v504_v28  ;;  %v459_v30 = vadd.f32 %v1141_v44, %v458_v29 }
 0x1af   : > { %530 = vst [vmem:[%s1144_s27 + $0x60] sm:$0xff] %v459_v30 }
 0x1b2   : > { %v506_v31 = vpop.f32.mrf.mxu3 }
 0x1b3   : > { %v507_v32 = vadd.f32 %v1141_v44, %v506_v31 }
 0x1b4   : > { %v461_v33 = vpop.f32.mrf.mxu1 }
 0x1b5   : > { %546 = vst [vmem:[%s1144_s27 + $0xe0] sm:$0xff] %v507_v32  ;;  %v462_v34 = vadd.f32 %v1141_v44, %v461_v33 }
 0x1b7   : > { %531 = vst [vmem:[%s1144_s27 + $0x68] sm:$0xff] %v462_v34 }
 0x1ba   : > { %v509_v35 = vpop.f32.mrf.mxu3 }
 0x1bb   : > { %v510_v36 = vadd.f32 %v1141_v44, %v509_v35 }
 0x1bc   : > { %v464_v37 = vpop.f32.mrf.mxu1 }
 0x1bd   : > { %547 = vst [vmem:[%s1144_s27 + $0xe8] sm:$0xff] %v510_v36  ;;  %v465_v38 = vadd.f32 %v1141_v44, %v464_v37 }
 0x1bf   : > { %532 = vst [vmem:[%s1144_s27 + $0x70] sm:$0xff] %v465_v38 }
 0x1c2   : > { %v512_v39 = vpop.f32.mrf.mxu3 }
 0x1c3   : > { %v513_v40 = vadd.f32 %v1141_v44, %v512_v39 }
 0x1c4   : > { %v467_v41 = vpop.f32.mrf.mxu1 }
 0x1c5   : > { %548 = vst [vmem:[%s1144_s27 + $0xf0] sm:$0xff] %v513_v40  ;;  %v468_v42 = vadd.f32 %v1141_v44, %v467_v41 }
 0x1c7   : > { %533 = vst [vmem:[%s1144_s27 + $0x78] sm:$0xff] %v468_v42 }
 0x1ca   : > { %v515_v43 = vpop.f32.mrf.mxu3 }
 0x1cb   : > { %v516_v45 = vadd.f32 %v1141_v44, %v515_v43 }
 0x1cd   : > { %549 = vst [vmem:[%s1144_s27 + $0xf8] sm:$0xff] %v516_v45 }
 0x1ce   : > { %896 = shalt.err (!%p893_p0)
}
 0x1cf   : > { %s962_s6 = smov 128   ;;  %s963_s1 = smov 8  }
 0x1d0   : > { %734 = dma.vmem_to_hbm [thread:$0]  (%p1063_p5), %s566_s26, 4096, %s568_s28, %s551_s15, %s962_s6, %s962_s6, %s963_s1  }
 0x1d1 PF: > { %s582_s20 = sand.u32 1, %s935_s12   ;;  %p745_p3 = pnand %p669_p11, %p1033_p6 }
 0x1d2   : > { %s583_s22 = scalar_lea.sflag [#allocation4], %s582_s20 }
 0x1d3   : > { %p746_p7 = pneg %p745_p3 }
 0x1d5   : > { %930 = dma.done.wait (%p746_p7), %s583_s22, 4096  }
 0x1d6   : > { %932 = vsyncadd (%p746_p7), %s583_s22, 4294963200  ;;  %s20_s17 = sadd.s32 1, %s955_s17   ;;  %s1261_s12 = smov %s939_s13 }
 0x1d7   : > { %p17_p9 = scmp.ge.s32.totalorder %s20_s17, 4   ;;  %s1262_s13 = smov %s943_s14 }
 0x1d8   : > { %s1263_s14 = smov %s1072_s18  ;;  %s1264_s15 = smov %s951_s16 }
 0x1d9   : > { %s1265_s16 = smov %s1267_s5  ;;  %19 = sbr.rel (!%p17_p9) target bundleno = 9 (0x9), region = 81 }
 0x1de   :  { %589 = vsyncpa [#allocation3], 1 }
 0x1df   :  { %591 = vsyncpa [#allocation3 + $0x1], 1 }
 0x1e0   :  { %592 = vsyncpa [#allocation6], 1 }
 0x1e1   :  { %593 = vsyncpa [#allocation4], 1 }
 0x1e2   :  { %595 = vsyncpa [#allocation4 + $0x1], 1 }

</bundles_post_ra>
